<compile_context>
chip_gen: v7x
topology: tpu7x:2x2x1
jax: 0.10.0
libtpu: 0.0.40
codegen_flags: <defaults>
</compile_context>

<pallas_src>
import numpy as np
import jax
import jax.numpy as jnp
from jax import lax
from jax.experimental import pallas as pl
from jax.experimental.pallas import tpu as pltpu

# Problem sizes (small, consistent with the module).
B, OBS, HID, ACT = 2, 16, 32, 4
LANE = 128                # TPU lane width
B_PAD = 8                 # batch padded to a full sublane group
TB = 8                    # timesteps per grid block in the rollout recurrence kernel

# Column offsets inside the packed weight/bias slabs (all 128-lane aligned).
C_HG = 0 * LANE           # h   -> [r | z | n]   (3 x LANE)
C_XG = 3 * LANE           # x   -> [r | z | n]   (3 x LANE)
C_IN = 6 * LANE           # obs -> x             (1 x LANE)
C_HD = 7 * LANE           # h   -> [mu | sigma]  (2 x LANE)
GW = 9 * LANE             # slab width; slab = (128, GW) f32 = 576 KiB


# ----------------------------------------------------------------------------- kernel math
def _gru_blend(gx, gh, b_hn, h_prev):
    """PyTorch GRUCell gate math on lane-padded (B_PAD, 3*LANE) gate pre-activations.

    gx already contains b_ir+b_hr / b_iz+b_hz / b_xn; gh contains no bias; b_hn is added
    inside the r-gating (matching torch.nn.GRUCell exactly).
    """
    r = jax.nn.sigmoid(gx[:, 0:LANE] + gh[:, 0:LANE])
    z = jax.nn.sigmoid(gx[:, LANE:2 * LANE] + gh[:, LANE:2 * LANE])
    n = jnp.tanh(gx[:, 2 * LANE:3 * LANE] + r * (gh[:, 2 * LANE:3 * LANE] + b_hn))
    return (1.0 - z) * n + z * h_prev


def _step_kernel(obs_ref, h_ref, w_ref, b_ref, out_ref):
    """Gridless single-env step: full actor (embed + GRU + heads) in one kernel."""
    obs = obs_ref[...]
    h = h_ref[...]
    w_in = w_ref[:, C_IN:C_IN + LANE]
    w_xg = w_ref[:, C_XG:C_XG + 3 * LANE]
    w_hg = w_ref[:, C_HG:C_HG + 3 * LANE]
    w_hd = w_ref[:, C_HD:C_HD + 2 * LANE]
    b_in = b_ref[:, C_IN:C_IN + LANE]                      # (8, .) : plain vreg adds
    b_xg = b_ref[:, C_XG:C_XG + 3 * LANE]
    b_hn = b_ref[:, C_HG + 2 * LANE:C_HG + 3 * LANE]
    b_hd = b_ref[:, C_HD:C_HD + 2 * LANE]

    x = jnp.tanh(jnp.dot(obs, w_in, preferred_element_type=jnp.float32) + b_in)
    gx = jnp.dot(x, w_xg, preferred_element_type=jnp.float32) + b_xg
    gh = jnp.dot(h, w_hg, preferred_element_type=jnp.float32)
    h_new = _gru_blend(gx, gh, b_hn, h)

    hd = jnp.dot(h_new, w_hd, preferred_element_type=jnp.float32) + b_hd
    mu = hd[:, 0:LANE]
    sigma = jax.nn.softplus(hd[:, LANE:2 * LANE]) + 1e-5
    # one lane-dense (8, 384) slab -> single unmasked writeback
    out_ref[...] = jnp.concatenate([mu, sigma, h_new], axis=-1)


def _recurrence_kernel(obs_ref, h0_ref, w_ref, b_ref, hseq_ref, gx_s, h_s):
    """Rollout recurrence: one grid step = TB timesteps.

    Batched (off the serial path): obs embedding + x-part of the gates for all TB steps.
    Serial (fori_loop, unrolled):  gh = h @ W_h (one K=128 MXU pass) + gates + blend.
    """
    @pl.when(pl.program_id(0) == 0)
    def _():
        h_s[...] = h0_ref[...]

    # ---- batched per-block input projection (M = TB*B_PAD rows on the MXU) ----
    obs = obs_ref[...].reshape(TB * B_PAD, LANE)
    w_in = w_ref[:, C_IN:C_IN + LANE]
    w_xg = w_ref[:, C_XG:C_XG + 3 * LANE]
    b_in = b_ref[0:1, C_IN:C_IN + LANE]                    # once-per-block broadcast is fine
    b_xg = b_ref[0:1, C_XG:C_XG + 3 * LANE]
    x = jnp.tanh(jnp.dot(obs, w_in, preferred_element_type=jnp.float32) + b_in)
    gx = jnp.dot(x, w_xg, preferred_element_type=jnp.float32) + b_xg
    gx_s[...] = gx.reshape(TB, B_PAD, 3 * LANE)

    # ---- serial GRU recurrence over the TB steps of this block ----
    w_hg = w_ref[:, C_HG:C_HG + 3 * LANE]                  # hoisted out of the loop
    b_hn = b_ref[:, C_HG + 2 * LANE:C_HG + 3 * LANE]       # (8, 128): plain vreg add in-loop

    def step(t, carry):
        gx_t = gx_s[t]
        h = h_s[...]
        gh = jnp.dot(h, w_hg, preferred_element_type=jnp.float32)
        h_new = _gru_blend(gx_t, gh, b_hn, h)
        h_s[...] = h_new
        hseq_ref[t] = h_new                                # only h is stored per step
        return carry

    lax.fori_loop(0, TB, step, 0, unroll=True)


def _head_kernel(hseq_ref, w_ref, b_ref, ms_ref):
    """Deferred policy heads: batched (TB*B_PAD, 128) @ (128, 256) + softplus, parallel grid."""
    h = hseq_ref[...].reshape(TB * B_PAD, LANE)
    w_hd = w_ref[:, C_HD:C_HD + 2 * LANE]
    b_hd = b_ref[0:1, C_HD:C_HD + 2 * LANE]
    hd = jnp.dot(h, w_hd, preferred_element_type=jnp.float32) + b_hd
    mu = hd[:, 0:LANE]
    sigma = jax.nn.softplus(hd[:, LANE:2 * LANE]) + 1e-5
    ms_ref[...] = jnp.concatenate([mu, sigma], axis=-1).reshape(TB, B_PAD, 2 * LANE)


# ----------------------------------------------------------------------------- pallas calls
@jax.jit
def _step_call(obs, h_pad, w_slab, b_slab):
    obs_pad = jnp.zeros((B_PAD, LANE), jnp.float32).at[:B, :OBS].set(obs)
    vmem = pltpu.MemorySpace.VMEM
    out = pl.pallas_call(
        _step_kernel,
        out_shape=jax.ShapeDtypeStruct((B_PAD, 3 * LANE), jnp.float32),
        in_specs=[pl.BlockSpec(memory_space=vmem)] * 4,    # gridless: no pipeline machinery
        out_specs=pl.BlockSpec(memory_space=vmem),
    )(obs_pad, h_pad, w_slab, b_slab)
    mu = out[:B, :ACT]
    sigma = out[:B, LANE:LANE + ACT]
    h_pad_new = out[:, 2 * LANE:3 * LANE]
    h_real = h_pad_new[:B, :HID]
    h_mean = h_real.mean(axis=0)                           # deferred tiny post-pass
    return mu, sigma, h_real, h_pad_new, h_mean


@jax.jit
def _rollout_call(obs_seq, h0_pad, w_slab, b_slab):
    T = obs_seq.shape[0]
    nb = pl.cdiv(T, TB)
    T_pad = nb * TB
    obs_pad = jnp.zeros((T_pad, B_PAD, LANE), jnp.float32).at[:T, :B, :OBS].set(obs_seq)

    # Phase 1: serial recurrence, TB timesteps per grid step, weights resident in VMEM.
    hseq = pl.pallas_call(
        _recurrence_kernel,
        out_shape=jax.ShapeDtypeStruct((T_pad, B_PAD, LANE), jnp.float32),
        grid_spec=pltpu.PrefetchScalarGridSpec(
            num_scalar_prefetch=0,
            grid=(nb,),
            in_specs=[
                pl.BlockSpec((TB, B_PAD, LANE), lambda i: (i, 0, 0)),   # obs block, pipelined
                pl.BlockSpec((B_PAD, LANE), lambda i: (0, 0)),          # h0, resident
                pl.BlockSpec((LANE, GW), lambda i: (0, 0)),             # weight slab, resident
                pl.BlockSpec((8, GW), lambda i: (0, 0)),                # bias slab, resident
            ],
            out_specs=pl.BlockSpec((TB, B_PAD, LANE), lambda i: (i, 0, 0)),
            scratch_shapes=[
                pltpu.VMEM((TB, B_PAD, 3 * LANE), jnp.float32),         # hoisted gx for block
                pltpu.VMEM((B_PAD, LANE), jnp.float32),                 # hidden-state carry
            ],
        ),
        compiler_params=pltpu.CompilerParams(
            dimension_semantics=("arbitrary",)),            # time recurrence is sequential
    )(obs_pad, h0_pad, w_slab, b_slab)

    # Phase 2: batched policy heads, independent per time block ("parallel": usable by 2 TCs).
    ms = pl.pallas_call(
        _head_kernel,
        out_shape=jax.ShapeDtypeStruct((T_pad, B_PAD, 2 * LANE), jnp.float32),
        grid_spec=pltpu.PrefetchScalarGridSpec(
            num_scalar_prefetch=0,
            grid=(nb,),
            in_specs=[
                pl.BlockSpec((TB, B_PAD, LANE), lambda i: (i, 0, 0)),
                pl.BlockSpec((LANE, GW), lambda i: (0, 0)),
                pl.BlockSpec((8, GW), lambda i: (0, 0)),
            ],
            out_specs=pl.BlockSpec((TB, B_PAD, 2 * LANE), lambda i: (i, 0, 0)),
        ),
        compiler_params=pltpu.CompilerParams(
            dimension_semantics=("parallel",)),
    )(hseq, w_slab, b_slab)

    mu_seq = ms[:T, :B, :ACT]
    sigma_seq = ms[:T, :B, LANE:LANE + ACT]
    hmean_seq = hseq[:T, :B, :HID].mean(axis=1)            # deferred post-pass reduction
    h_fin_pad = hseq[T - 1]
    h_fin = h_fin_pad[:B, :HID]
    return mu_seq, sigma_seq, hmean_seq, h_fin, h_fin_pad


# ----------------------------------------------------------------------------- param packing
def pack_params(p):
    """Pack the 10 natural-layout params into one (128, GW) weight slab + one (8, GW) bias slab."""
    H = HID
    pn = {k: np.asarray(v, np.float32) for k, v in p.items()}

    w = np.zeros((LANE, GW), np.float32)
    # GRU h-part: [r | z | n]
    w[0:H, C_HG + 0 * LANE:C_HG + 0 * LANE + H] = pn["w_hg"][:, 0:H]
    w[0:H, C_HG + 1 * LANE:C_HG + 1 * LANE + H] = pn["w_hg"][:, H:2 * H]
    w[0:H, C_HG + 2 * LANE:C_HG + 2 * LANE + H] = pn["w_hg"][:, 2 * H:3 * H]
    # GRU x-part: [r | z | n]
    w[0:H, C_XG + 0 * LANE:C_XG + 0 * LANE + H] = pn["w_xg"][:, 0:H]
    w[0:H, C_XG + 1 * LANE:C_XG + 1 * LANE + H] = pn["w_xg"][:, H:2 * H]
    w[0:H, C_XG + 2 * LANE:C_XG + 2 * LANE + H] = pn["w_xg"][:, 2 * H:3 * H]
    # obs embedding
    w[0:OBS, C_IN:C_IN + H] = pn["w_in"]
    # policy heads [mu | sigma]
    w[0:H, C_HD:C_HD + ACT] = pn["w_mu"]
    w[0:H, C_HD + LANE:C_HD + LANE + ACT] = pn["w_sg"]

    # biases, pre-broadcast to all 8 sublanes (in-kernel "+b" is a plain vreg add)
    b = np.zeros((8, GW), np.float32)
    b[:, C_HG + 2 * LANE:C_HG + 2 * LANE + H] = pn["b_hg"][2 * H:3 * H]            # b_hn (r-gated)
    b[:, C_XG + 0 * LANE:C_XG + 0 * LANE + H] = pn["b_xg"][0:H] + pn["b_hg"][0:H]  # r bias (folded)
    b[:, C_XG + 1 * LANE:C_XG + 1 * LANE + H] = pn["b_xg"][H:2 * H] + pn["b_hg"][H:2 * H]
    b[:, C_XG + 2 * LANE:C_XG + 2 * LANE + H] = pn["b_xg"][2 * H:3 * H]            # b_xn
    b[:, C_IN:C_IN + H] = pn["b_in"]
    b[:, C_HD:C_HD + ACT] = pn["b_mu"]
    b[:, C_HD + LANE:C_HD + LANE + ACT] = pn["b_sg"]

    # Padded-lane hygiene (correctness concern): every padded row/column must be exactly zero,
    # otherwise garbage would leak into h through the z-blend.
    assert not w[H:, :].any(), "padded weight rows must be zero"
    for blk in range(GW // LANE):
        width = ACT if blk >= C_HD // LANE else H
        assert not w[:, blk * LANE + width:(blk + 1) * LANE].any(), "padded weight lanes nonzero"
        assert not b[:, blk * LANE + width:(blk + 1) * LANE].any(), "padded bias lanes nonzero"

    return jnp.asarray(w), jnp.asarray(b)


def init_params(key):
    ks = jax.random.split(key, 8)
    return {
        "w_in": 0.1 * jax.random.normal(ks[0], (OBS, HID), jnp.float32),
        "b_in": jnp.zeros((HID,), jnp.float32),
        "w_xg": 0.1 * jax.random.normal(ks[1], (HID, 3 * HID), jnp.float32),   # cols [r|z|n]
        "b_xg": 0.05 * jax.random.normal(ks[2], (3 * HID,), jnp.float32),
        "w_hg": 0.1 * jax.random.normal(ks[3], (HID, 3 * HID), jnp.float32),
        "b_hg": 0.05 * jax.random.normal(ks[4], (3 * HID,), jnp.float32),
        "w_mu": 0.1 * jax.random.normal(ks[5], (HID, ACT), jnp.float32),
        "b_mu": jnp.zeros((ACT,), jnp.float32),
        "w_sg": 0.1 * jax.random.normal(ks[6], (HID, ACT), jnp.float32),
        "b_sg": jnp.zeros((ACT,), jnp.float32),
    }


def ref_actor_step(params, obs, h_prev):
    """Pure-JAX reference (PyTorch GRUCell semantics) for cross-checking the kernels."""
    # NOTE: both ref and kernels use default MXU precision (bf16 passes), hence the 2e-2
    # tolerance against the independently-packed reference; pass precision=HIGHEST if
    # bit-closeness to torch is required.
    H = HID
    x = jnp.tanh(obs @ params["w_in"] + params["b_in"])
    gx = x @ params["w_xg"] + params["b_xg"]
    gh = h_prev @ params["w_hg"] + params["b_hg"]
    r = jax.nn.sigmoid(gx[:, :H] + gh[:, :H])
    z = jax.nn.sigmoid(gx[:, H:2 * H] + gh[:, H:2 * H])
    n = jnp.tanh(gx[:, 2 * H:] + r * gh[:, 2 * H:])
    h_new = (1.0 - z) * n + z * h_prev
    mu = h_new @ params["w_mu"] + params["b_mu"]
    sigma = jax.nn.softplus(h_new @ params["w_sg"] + params["b_sg"]) + 1e-5
    return mu, sigma, h_new


# ----------------------------------------------------------------------------- wrapper
class DebugNet:
    """JAX/Pallas mirror of the PyTorch DebugNet wrapper (debug bookkeeping included)."""

    def __init__(self, params, debug=True):
        self.w_slab, self.b_slab = pack_params(params)
        self.debug = debug
        self.hidden_state_before_reset = None
        self.hidden_states = []
        self.mu_history = []
        self.sigma_history = []

    def _h_pad_from_state(self, state):
        if state is None:
            return jnp.zeros((B_PAD, LANE), jnp.float32)
        if "hidden_padded" in state:
            return state["hidden_padded"]
        return jnp.zeros((B_PAD, LANE), jnp.float32).at[:B, :HID].set(state["hidden"])

    def __call__(self, obs, state=None, info={}):
        # Single-env step (latency path).  For whole trajectories prefer rollout().
        h_pad = self._h_pad_from_state(state)
        mu, sigma, h_real, h_pad_new, h_mean = _step_call(obs, h_pad, self.w_slab, self.b_slab)
        h_n = {"hidden": h_real, "hidden_padded": h_pad_new}
        if self.debug and h_n is not None and ("hidden" in h_n):
            self.hidden_states.append(h_mean)          # hidden.mean(dim=0)
            self.mu_history.append(mu)
            self.sigma_history.append(sigma)
        return (mu, sigma), h_n

    def rollout(self, obs_seq, state=None):
        """Run T actor steps with the time-blocked recurrence kernel + batched head kernel."""
        h_pad = self._h_pad_from_state(state)
        mu_seq, sigma_seq, hmean_seq, h_fin, h_fin_pad = _rollout_call(
            obs_seq, h_pad, self.w_slab, self.b_slab)
        if self.debug:
            for t in range(obs_seq.shape[0]):
                self.hidden_states.append(hmean_seq[t])
                self.mu_history.append(mu_seq[t])
                self.sigma_history.append(sigma_seq[t])
        return (mu_seq, sigma_seq), {"hidden": h_fin, "hidden_padded": h_fin_pad}


# ----------------------------------------------------------------------------- main
if __name__ == "__main__":
    key = jax.random.PRNGKey(0)
    k_param, k_obs = jax.random.split(key)
    params = init_params(k_param)
    net = DebugNet(params, debug=True)

    T = 16                                                   # 2 time blocks of TB=8
    obs_seq = jax.random.normal(k_obs, (T, B, OBS), jnp.float32)

    # single-step path (gridless fused kernel), stepping the recurrent state from Python
    state = None
    step_mu, step_sigma, step_hmean = [], [], []
    for t in range(T):
        (mu, sigma), state = net(obs_seq[t], state=state)
        step_mu.append(mu)
        step_sigma.append(sigma)
        step_hmean.append(net.hidden_states[-1])
    jax.block_until_ready(state["hidden"])

    # rollout path: time-blocked recurrence kernel + parallel batched head kernel
    (mu_seq, sigma_seq), roll_state = net.rollout(obs_seq, state=None)
    jax.block_until_ready(roll_state["hidden"])

    # cross-checks: kernel vs pure-JAX reference (step 0), rollout vs stepped kernel
    mu_ref, sigma_ref, _ = ref_actor_step(params, obs_seq[0], jnp.zeros((B, HID), jnp.float32))
    np.testing.assert_allclose(np.asarray(step_mu[0]), np.asarray(mu_ref), atol=2e-2, rtol=2e-2)
    np.testing.assert_allclose(np.asarray(step_sigma[0]), np.asarray(sigma_ref), atol=2e-2, rtol=2e-2)
    for t in range(T):
        np.testing.assert_allclose(np.asarray(mu_seq[t]), np.asarray(step_mu[t]),
                                   atol=1e-5, rtol=1e-5)
        np.testing.assert_allclose(np.asarray(sigma_seq[t]), np.asarray(step_sigma[t]),
                                   atol=1e-5, rtol=1e-5)
        np.testing.assert_allclose(np.asarray(net.hidden_states[T + t]),
                                   np.asarray(step_hmean[t]), atol=1e-5, rtol=1e-5)
    np.testing.assert_allclose(np.asarray(roll_state["hidden"]), np.asarray(state["hidden"]),
                               atol=1e-5, rtol=1e-5)

    assert step_mu[0].shape == (B, ACT) and step_sigma[0].shape == (B, ACT)
    assert mu_seq.shape == (T, B, ACT) and sigma_seq.shape == (T, B, ACT)
    assert state["hidden"].shape == (B, HID)
    assert net.hidden_states[0].shape == (HID,)
    assert len(net.mu_history) == 2 * T and len(net.sigma_history) == 2 * T
    print("KERNEL_OK")
</pallas_src>

<mosaic_0001>
module attributes {stable_mosaic.version = 11 : i64} {
  func.func @_step_kernel(%arg0: memref<8x128xf32, #tpu.memory_space<vmem>>, %arg1: memref<8x128xf32, #tpu.memory_space<vmem>>, %arg2: memref<128x1152xf32, #tpu.memory_space<vmem>>, %arg3: memref<8x1152xf32, #tpu.memory_space<vmem>>, %arg4: memref<8x384xf32, #tpu.memory_space<vmem>>) attributes {dimension_semantics = [], scalar_prefetch = 0 : i64, scratch_operands = 0 : i64, tpu.core_type = #tpu.core_type<tc>} {
    %c0 = arith.constant 0 : index
    %c0_0 = arith.constant 0 : index
    %0 = vector.load %arg0[%c0, %c0_0] : memref<8x128xf32, #tpu.memory_space<vmem>>, vector<8x128xf32>
    %c0_1 = arith.constant 0 : index
    %c0_2 = arith.constant 0 : index
    %1 = vector.load %arg1[%c0_1, %c0_2] : memref<8x128xf32, #tpu.memory_space<vmem>>, vector<8x128xf32>
    %c0_3 = arith.constant 0 : index
    %c768 = arith.constant 768 : index
    %2 = vector.load %arg2[%c0_3, %c768] : memref<128x1152xf32, #tpu.memory_space<vmem>>, vector<128x128xf32>
    %c0_4 = arith.constant 0 : index
    %c384 = arith.constant 384 : index
    %3 = vector.load %arg2[%c0_4, %c384] : memref<128x1152xf32, #tpu.memory_space<vmem>>, vector<128x384xf32>
    %c0_5 = arith.constant 0 : index
    %c0_6 = arith.constant 0 : index
    %4 = vector.load %arg2[%c0_5, %c0_6] : memref<128x1152xf32, #tpu.memory_space<vmem>>, vector<128x384xf32>
    %c0_7 = arith.constant 0 : index
    %c896 = arith.constant 896 : index
    %5 = vector.load %arg2[%c0_7, %c896] : memref<128x1152xf32, #tpu.memory_space<vmem>>, vector<128x256xf32>
    %c0_8 = arith.constant 0 : index
    %c768_9 = arith.constant 768 : index
    %6 = vector.load %arg3[%c0_8, %c768_9] : memref<8x1152xf32, #tpu.memory_space<vmem>>, vector<8x128xf32>
    %c0_10 = arith.constant 0 : index
    %c384_11 = arith.constant 384 : index
    %7 = vector.load %arg3[%c0_10, %c384_11] : memref<8x1152xf32, #tpu.memory_space<vmem>>, vector<8x384xf32>
    %c0_12 = arith.constant 0 : index
    %c256 = arith.constant 256 : index
    %8 = vector.load %arg3[%c0_12, %c256] : memref<8x1152xf32, #tpu.memory_space<vmem>>, vector<8x128xf32>
    %c0_13 = arith.constant 0 : index
    %c896_14 = arith.constant 896 : index
    %9 = vector.load %arg3[%c0_13, %c896_14] : memref<8x1152xf32, #tpu.memory_space<vmem>>, vector<8x256xf32>
    %cst = arith.constant dense<0.000000e+00> : vector<8x128xf32>
    %10 = tpu.matmul %0, %2, %cst {dimension_numbers = #tpu.dot_dimension_numbers<[1], [0], [0], [1], [0, 0, 1, 1], [], []>} : vector<8x128xf32>, vector<128x128xf32>, vector<8x128xf32> -> vector<8x128xf32>
    %11 = arith.addf %10, %6 : vector<8x128xf32>
    %12 = math.tanh %11 : vector<8x128xf32>
    %cst_15 = arith.constant dense<0.000000e+00> : vector<8x384xf32>
    %13 = tpu.matmul %12, %3, %cst_15 {dimension_numbers = #tpu.dot_dimension_numbers<[1], [0], [0], [1], [0, 0, 1, 1], [], []>} : vector<8x128xf32>, vector<128x384xf32>, vector<8x384xf32> -> vector<8x384xf32>
    %14 = arith.addf %13, %7 : vector<8x384xf32>
    %cst_16 = arith.constant dense<0.000000e+00> : vector<8x384xf32>
    %15 = tpu.matmul %1, %4, %cst_16 {dimension_numbers = #tpu.dot_dimension_numbers<[1], [0], [0], [1], [0, 0, 1, 1], [], []>} : vector<8x128xf32>, vector<128x384xf32>, vector<8x384xf32> -> vector<8x384xf32>
    %16 = vector.extract_strided_slice %14 {offsets = [0, 0], sizes = [8, 128], strides = [1, 1]} : vector<8x384xf32> to vector<8x128xf32>
    %17 = vector.extract_strided_slice %15 {offsets = [0, 0], sizes = [8, 128], strides = [1, 1]} : vector<8x384xf32> to vector<8x128xf32>
    %18 = arith.addf %16, %17 : vector<8x128xf32>
    %19 = arith.negf %18 : vector<8x128xf32>
    %20 = math.exp %19 : vector<8x128xf32>
    %cst_17 = arith.constant 1.000000e+00 : f32
    %21 = vector.broadcast %cst_17 : f32 to vector<8x128xf32>
    %22 = arith.addf %21, %20 : vector<8x128xf32>
    %23 = arith.divf %21, %22 : vector<8x128xf32>
    %24 = vector.extract_strided_slice %14 {offsets = [0, 128], sizes = [8, 128], strides = [1, 1]} : vector<8x384xf32> to vector<8x128xf32>
    %25 = vector.extract_strided_slice %15 {offsets = [0, 128], sizes = [8, 128], strides = [1, 1]} : vector<8x384xf32> to vector<8x128xf32>
    %26 = arith.addf %24, %25 : vector<8x128xf32>
    %27 = arith.negf %26 : vector<8x128xf32>
    %28 = math.exp %27 : vector<8x128xf32>
    %cst_18 = arith.constant 1.000000e+00 : f32
    %29 = vector.broadcast %cst_18 : f32 to vector<8x128xf32>
    %30 = arith.addf %29, %28 : vector<8x128xf32>
    %31 = arith.divf %29, %30 : vector<8x128xf32>
    %32 = vector.extract_strided_slice %14 {offsets = [0, 256], sizes = [8, 128], strides = [1, 1]} : vector<8x384xf32> to vector<8x128xf32>
    %33 = vector.extract_strided_slice %15 {offsets = [0, 256], sizes = [8, 128], strides = [1, 1]} : vector<8x384xf32> to vector<8x128xf32>
    %34 = arith.addf %33, %8 : vector<8x128xf32>
    %35 = arith.mulf %23, %34 : vector<8x128xf32>
    %36 = arith.addf %32, %35 : vector<8x128xf32>
    %37 = math.tanh %36 : vector<8x128xf32>
    %cst_19 = arith.constant 1.000000e+00 : f32
    %38 = vector.broadcast %cst_19 : f32 to vector<8x128xf32>
    %39 = arith.subf %38, %31 : vector<8x128xf32>
    %40 = arith.mulf %39, %37 : vector<8x128xf32>
    %41 = arith.mulf %31, %1 : vector<8x128xf32>
    %42 = arith.addf %40, %41 : vector<8x128xf32>
    %cst_20 = arith.constant dense<0.000000e+00> : vector<8x256xf32>
    %43 = tpu.matmul %42, %5, %cst_20 {dimension_numbers = #tpu.dot_dimension_numbers<[1], [0], [0], [1], [0, 0, 1, 1], [], []>} : vector<8x128xf32>, vector<128x256xf32>, vector<8x256xf32> -> vector<8x256xf32>
    %44 = arith.addf %43, %9 : vector<8x256xf32>
    %45 = vector.extract_strided_slice %44 {offsets = [0, 0], sizes = [8, 128], strides = [1, 1]} : vector<8x256xf32> to vector<8x128xf32>
    %46 = vector.extract_strided_slice %44 {offsets = [0, 128], sizes = [8, 128], strides = [1, 1]} : vector<8x256xf32> to vector<8x128xf32>
    %cst_21 = arith.constant 0.000000e+00 : f32
    %47 = vector.broadcast %cst_21 : f32 to vector<8x128xf32>
    %48 = arith.maximumf %46, %47 : vector<8x128xf32>
    %49 = vector.broadcast %cst_21 : f32 to vector<8x128xf32>
    %50 = arith.subf %46, %49 : vector<8x128xf32>
    %51 = arith.cmpf one, %50, %50 : vector<8x128xf32>
    %52 = vector.broadcast %cst_21 : f32 to vector<8x128xf32>
    %53 = arith.addf %46, %52 : vector<8x128xf32>
    %54 = math.absf %50 : vector<8x128xf32>
    %cst_22 = arith.constant 0.000000e+00 : f32
    %55 = vector.broadcast %cst_22 : f32 to vector<8x128xf32>
    %56 = arith.subf %55, %54 : vector<8x128xf32>
    %57 = math.exp %56 : vector<8x128xf32>
    %58 = math.log1p %57 : vector<8x128xf32>
    %59 = arith.addf %48, %58 : vector<8x128xf32>
    %60 = arith.select %51, %53, %59 : vector<8x128xi1>, vector<8x128xf32>
    %cst_23 = arith.constant 9.99999974E-6 : f32
    %61 = vector.broadcast %cst_23 : f32 to vector<8x128xf32>
    %62 = arith.addf %60, %61 : vector<8x128xf32>
    %63 = tpu.concatenate %45, %62, %42 in 1 : vector<8x128xf32>, vector<8x128xf32>, vector<8x128xf32> -> vector<8x384xf32>
    %c0_24 = arith.constant 0 : index
    %c0_25 = arith.constant 0 : index
    %64 = vector.load %arg4[%c0_24, %c0_25] : memref<8x384xf32, #tpu.memory_space<vmem>>, vector<8x384xf32>
    tpu.vector_store %arg4[%c0_24, %c0_25], %63 {strides = array<i32>} : memref<8x384xf32, #tpu.memory_space<vmem>>, vector<8x384xf32>,
    return
  }
}

</mosaic_0001>

<bundles_post_ra>
// kernel: _step_call.1
= control target key start
LH: loop header
LB: loop body
LE: loop exit
PB: predicated region body
PF: predicated region fallthrough
CT: control target
= control target key end

     0   :  { %9 = vsyncpa [#allocation3], 0  ;;  %s1180_s0 = inlined_call_operand.vmem [shape: f32[8,128], index: 0, kind: input, shape index: {}]   ;;  %s1181_s1 = inlined_call_operand.vmem [shape: f32[8,128], index: 1, kind: input, shape index: {}]   ;;  %s1182_s2 = inlined_call_operand.hbm [shape: f32[128,1152], index: 2, kind: input, shape index: {}]   ;;  %s1183_s3 = inlined_call_operand.hbm [shape: f32[8,1152], index: 3, kind: input, shape index: {}]   ;;  %s1184_s4 = inlined_call_operand.vmem [shape: f32[8,384], index: 4, kind: output, shape index: {}]  }
   0x1   :  { %10 = vsyncpa [#allocation5], 0  ;;  %s1071_s15 = smov [#allocation2]   ;;  %s1023_s19 = scalar_lea.hbm %s1182_s2, 18432 }
   0x2   :  { %s20_s16 = sshll.u32 %s1071_s15, 4  ;;  %p1024_p0 = scmp.ne.s32.totalorder %s1182_s2, %s1023_s19  ;;  %s21_s16 = int_to_ptr.vmem [resolvable:$true] %s20_s16 }
   0x3   :  { %p1027_p1 = scmp.lt.u32.totalorder %s1023_s19, %s1182_s2 }
   0x5   :  { %p1029_p2 = pnand %p1027_p1, %p1024_p0 }
   0x7   :  { %1032 = shalt.err (!%p1029_p2)
}
   0x8   :  { %s1033_s24 = scalar_lea.vmem %s21_s16, 18432  ;;  %p1038_p4 = scmp.lt.s32.totalorder %s21_s16, %s21_s16 }
   0x9   :  { %p1034_p3 = scmp.ne.s32.totalorder %s21_s16, %s1033_s24  ;;  %p1039_p5 = scmp.lt.s32.totalorder %s1033_s24, %s1033_s24 }
   0xb   :  { %p1040_p6 = por %p1039_p5, %p1038_p4 }
   0xd   :  { %p1041_p7 = pnand %p1040_p6, %p1034_p3 }
   0xf   :  { %1044 = shalt.err (!%p1041_p7)
}
  0x10   :  { %s1072_s25 = smov 1152   ;;  %s1073_s26 = smov 72  }
  0x11   :  { %26 = dma.hbm_to_vmem [thread:$0]  %s1182_s2, 18432, %s21_s16, [#allocation3], %s1072_s25, %s1072_s25, %s1073_s26  }
  0x12   :  { %s1074_s29 = smov [#allocation4]   ;;  %s1045_s7 = scalar_lea.hbm %s1183_s3, 1152 }
  0x13   :  { %s33_s30 = sshll.u32 %s1074_s29, 4  ;;  %p1046_p8 = scmp.ne.s32.totalorder %s1183_s3, %s1045_s7  ;;  %s34_s30 = int_to_ptr.vmem [resolvable:$true] %s33_s30 }
  0x14   :  { %p1049_p9 = scmp.lt.u32.totalorder %s1045_s7, %s1183_s3 }
  0x16   :  { %p1051_p10 = pnand %p1049_p9, %p1046_p8 }
  0x18   :  { %1054 = shalt.err (!%p1051_p10)
}
  0x19   :  { %s1055_s12 = scalar_lea.vmem %s34_s30, 1152  ;;  %p1060_p12 = scmp.lt.s32.totalorder %s34_s30, %s34_s30 }
  0x1a   :  { %p1056_p11 = scmp.ne.s32.totalorder %s34_s30, %s1055_s12  ;;  %p1061_p13 = scmp.lt.s32.totalorder %s1055_s12, %s1055_s12 }
  0x1c   :  { %p1062_p0 = por %p1061_p13, %p1060_p12 }
  0x1e   :  { %p1063_p1 = pnand %p1062_p0, %p1056_p11 }
  0x20   :  { %1066 = shalt.err (!%p1063_p1)
}
  0x21   :  { %36 = dma.hbm_to_vmem [thread:$0]  %s1183_s3, 1152, %s34_s30, [#allocation5]  }
  0x22   :  { %1067 = dma.done.wait [#allocation3], 18432  }
  0x23   :  { %1068 = vsyncadd [#allocation3], 4294948864 }
  0x24   :  { %1069 = dma.done.wait [#allocation5], 1152  }
  0x25   :  { %1070 = vsyncadd [#allocation5], 4294966144  ;;  %v1075_v0 = vmov 0.0|0.0   ;;  %vm1076_vm0 = vmmov 0   ;;  %v1077_v1 = vmov 0.0   ;;  %v45_v2 = vld [vmem:[#allocation2 + $0x30] sm:$0xff] }
  0x26   :  { %828 = vmatprep.subr.bf16.mxu0 %v1075_v0  ;;  %755 = vmatprep.mubr.msk.f32.mxu0 %vm1076_vm0, %v1077_v1  ;;  %v46_v3 = vld [vmem:[#allocation2 + $0x78] sm:$0xff]  ;;  %v47_v4 = vld [vmem:[#allocation2 + $0xc0] sm:$0xff]  ;;  %v48_v6 = vld [vmem:[#allocation2 + $0x108] sm:$0xff] }
  0x27   :  { %331 = vmatprep.mubr.f32.mxu1 %v1077_v1  ;;  %v829_v5 = vpack.c.bf16 %v46_v3, %v45_v2  ;;  %v832_v7 = vpack.c.bf16 %v48_v6, %v47_v4  ;;  %v49_v8 = vld [vmem:[#allocation2 + $0x150] sm:$0xff]  ;;  %v50_v9 = vld [vmem:[#allocation2 + $0x198] sm:$0xff]  ;;  %v62_v10 = vld [vmem:[#allocation2 + $0x20] sm:$0xff] }
  0x28   :  { %v65_v11 = vld [vmem:[#allocation2 + $0x68] sm:$0xff]  ;;  %v61_v12 = vld [vmem:[#allocation2 + $0x18] sm:$0xff]  ;;  %v64_v13 = vld [vmem:[#allocation2 + $0x60] sm:$0xff]  ;;  %v835_v14 = vpack.c.bf16 %v50_v9, %v49_v8 }
  0x29   :  { %830 = vmatpush3.bf16.msra.mxu0 %v829_v5  ;;  %v51_v15 = vld [vmem:[#allocation2 + $0x1e0] sm:$0xff]  ;;  %v52_v16 = vld [vmem:[#allocation2 + $0x228] sm:$0xff]  ;;  %v852_v17 = vpack.c.bf16 %v65_v11, %v62_v10  ;;  %v854_v18 = vpack.c.bf16 %v64_v13, %v61_v12  ;;  %v68_v19 = vld [vmem:[#allocation2 + $0xb0] sm:$0xff] }
  0x2a   :  { %831 = vmatprep.subr.bf16.mxu0 %v1075_v0  ;;  %v71_v20 = vld [vmem:[#allocation2 + $0xf8] sm:$0xff]  ;;  %v67_v21 = vld [vmem:[#allocation2 + $0xa8] sm:$0xff]  ;;  %v70_v22 = vld [vmem:[#allocation2 + $0xf0] sm:$0xff]  ;;  %v838_v27 = vpack.c.bf16 %v52_v16, %v51_v15 }
  0x2b   :  { %853 = vmatprep.subr.bf16.mxu1 %v852_v17  ;;  %v856_v23 = vpack.c.bf16 %v71_v20, %v68_v19  ;;  %v74_v24 = vld [vmem:[#allocation2 + $0x140] sm:$0xff]  ;;  %v858_v25 = vpack.c.bf16 %v70_v22, %v67_v21  ;;  %v77_v26 = vld [vmem:[#allocation2 + $0x188] sm:$0xff]  ;;  %v53_v28 = vld [vmem:[#allocation2 + $0x270] sm:$0xff] }
  0x2c   :  { %855 = vmatpush1.bf16.msra.mxu1 %v854_v18  ;;  %v860_v29 = vpack.c.bf16 %v77_v26, %v74_v24  ;;  %v73_v30 = vld [vmem:[#allocation2 + $0x138] sm:$0xff]  ;;  %v76_v31 = vld [vmem:[#allocation2 + $0x180] sm:$0xff]  ;;  %v80_v33 = vld [vmem:[#allocation2 + $0x1d0] sm:$0xff] }
  0x2d   :  { %833 = vmatpush3.bf16.msra.mxu0 %v832_v7  ;;  %857 = vmatprep.subr.bf16.mxu1 %v856_v23  ;;  %v54_v32 = vld [vmem:[#allocation2 + $0x2b8] sm:$0xff]  ;;  %v862_v35 = vpack.c.bf16 %v76_v31, %v73_v30  ;;  %v55_v37 = vld [vmem:[#allocation2 + $0x300] sm:$0xff]  ;;  %v79_v39 = vld [vmem:[#allocation2 + $0x1c8] sm:$0xff] }
  0x2e   :  { %834 = vmatprep.subr.bf16.mxu0 %v1075_v0  ;;  %v83_v34 = vld [vmem:[#allocation2 + $0x218] sm:$0xff]  ;;  %v841_v36 = vpack.c.bf16 %v54_v32, %v53_v28  ;;  %v82_v40 = vld [vmem:[#allocation2 + $0x210] sm:$0xff]  ;;  %v56_v41 = vld [vmem:[#allocation2 + $0x348] sm:$0xff] }
  0x2f   :  { %v864_v38 = vpack.c.bf16 %v83_v34, %v80_v33  ;;  %v86_v42 = vld [vmem:[#allocation2 + $0x260] sm:$0xff]  ;;  %v89_v43 = vld [vmem:[#allocation2 + $0x2a8] sm:$0xff]  ;;  %v866_v44 = vpack.c.bf16 %v82_v40, %v79_v39  ;;  %v844_v45 = vpack.c.bf16 %v56_v41, %v55_v37  ;;  %v85_v47 = vld [vmem:[#allocation2 + $0x258] sm:$0xff] }
  0x30   :  { %859 = vmatpush1.bf16.msra.mxu1 %v858_v25  ;;  %v868_v46 = vpack.c.bf16 %v89_v43, %v86_v42  ;;  %v88_v48 = vld [vmem:[#allocation2 + $0x2a0] sm:$0xff]  ;;  %v57_v49 = vld [vmem:[#allocation2 + $0x390] sm:$0xff]  ;;  %v58_v50 = vld [vmem:[#allocation2 + $0x3d8] sm:$0xff] }
  0x31   :  { %836 = vmatpush3.bf16.msra.mxu0 %v835_v14  ;;  %861 = vmatprep.subr.bf16.mxu1 %v860_v29  ;;  %v870_v51 = vpack.c.bf16 %v88_v48, %v85_v47  ;;  %v847_v52 = vpack.c.bf16 %v58_v50, %v57_v49  ;;  %v59_v53 = vld [vmem:[#allocation2 + $0x420] sm:$0xff]  ;;  %v60_v54 = vld [vmem:[#allocation2 + $0x468] sm:$0xff]  ;;  %v66_v57 = vld [vmem:[#allocation2 + $0x70] sm:$0xff] }
  0x32   :  { %837 = vmatprep.subr.bf16.mxu0 %v1075_v0  ;;  %v850_v55 = vpack.c.bf16 %v60_v54, %v59_v53  ;;  %v63_v56 = vld [vmem:[#allocation2 + $0x28] sm:$0xff]  ;;  %v43_v58 = vld [vmem:[%s1180_s0] sm:$0xff]  ;;  %v69_v60 = vld [vmem:[#allocation2 + $0xb8] sm:$0xff] }
  0x33   :  { %v885_v59 = vpack.c.bf16 %v66_v57, %v63_v56  ;;  %v72_v61 = vld [vmem:[#allocation2 + $0x100] sm:$0xff]  ;;  %v75_v63 = vld [vmem:[#allocation2 + $0x148] sm:$0xff]  ;;  %v78_v2 = vld [vmem:[#allocation2 + $0x190] sm:$0xff] }
  0x34   :  { %863 = vmatpush1.bf16.msra.mxu1 %v862_v35  ;;  %v888_v62 = vpack.c.bf16 %v72_v61, %v69_v60  ;;  %v891_v3 = vpack.c.bf16 %v78_v2, %v75_v63  ;;  %v81_v4 = vld [vmem:[#allocation2 + $0x1d8] sm:$0xff]  ;;  %v84_v5 = vld [vmem:[#allocation2 + $0x220] sm:$0xff]  ;;  %v87_v7 = vld [vmem:[#allocation2 + $0x268] sm:$0xff] }
  0x35   :  { %839 = vmatpush3.bf16.msra.mxu0 %v838_v27  ;;  %865 = vmatprep.subr.bf16.mxu1 %v864_v38  ;;  %v894_v6 = vpack.c.bf16 %v84_v5, %v81_v4  ;;  %v90_v8 = vld [vmem:[#allocation2 + $0x2b0] sm:$0xff]  ;;  %v95_v11 = vld [vmem:[#allocation2 + $0x338] sm:$0xff]  ;;  %v91_v13 = vld [vmem:[#allocation2 + $0x2e8] sm:$0xff] }
  0x36   :  { %840 = vmatprep.subr.bf16.mxu0 %v1075_v0  ;;  %v897_v9 = vpack.c.bf16 %v90_v8, %v87_v7  ;;  %v92_v10 = vld [vmem:[#allocation2 + $0x2f0] sm:$0xff]  ;;  %v93_v16 = vld [vmem:[#allocation2 + $0x2f8] sm:$0xff]  ;;  %v96_v17 = vld [vmem:[#allocation2 + $0x340] sm:$0xff] }
  0x37   :  { %v872_v12 = vpack.c.bf16 %v95_v11, %v92_v10  ;;  %v94_v14 = vld [vmem:[#allocation2 + $0x330] sm:$0xff]  ;;  %v900_v18 = vpack.c.bf16 %v96_v17, %v93_v16  ;;  %v98_v19 = vld [vmem:[#allocation2 + $0x380] sm:$0xff]  ;;  %v101_v20 = vld [vmem:[#allocation2 + $0x3c8] sm:$0xff] }
  0x38   :  { %867 = vmatpush1.bf16.msra.mxu1 %v866_v44  ;;  %v874_v15 = vpack.c.bf16 %v94_v14, %v91_v13  ;;  %v876_v21 = vpack.c.bf16 %v101_v20, %v98_v19  ;;  %v97_v22 = vld [vmem:[#allocation2 + $0x378] sm:$0xff]  ;;  %v100_v23 = vld [vmem:[#allocation2 + $0x3c0] sm:$0xff]  ;;  %v99_v24 = vld [vmem:[#allocation2 + $0x388] sm:$0xff] }
  0x39   :  { %842 = vmatpush3.bf16.msra.mxu0 %v841_v36  ;;  %869 = vmatprep.subr.bf16.mxu1 %v868_v46  ;;  %v878_v25 = vpack.c.bf16 %v100_v23, %v97_v22  ;;  %v102_v26 = vld [vmem:[#allocation2 + $0x3d0] sm:$0xff]  ;;  %v107_v28 = vld [vmem:[#allocation2 + $0x458] sm:$0xff]  ;;  %v103_v31 = vld [vmem:[#allocation2 + $0x408] sm:$0xff] }
  0x3a   :  { %843 = vmatprep.subr.bf16.mxu0 %v1075_v0  ;;  %v104_v27 = vld [vmem:[#allocation2 + $0x410] sm:$0xff]  ;;  %v903_v29 = vpack.c.bf16 %v102_v26, %v99_v24  ;;  %v105_v33 = vld [vmem:[#allocation2 + $0x418] sm:$0xff]  ;;  %v108_v35 = vld [vmem:[#allocation2 + $0x460] sm:$0xff] }
  0x3b   :  { %v880_v30 = vpack.c.bf16 %v107_v28, %v104_v27  ;;  %v106_v32 = vld [vmem:[#allocation2 + $0x450] sm:$0xff]  ;;  %v110_v36 = vld [vmem:[#allocation2 + $0x8] sm:$0xff]  ;;  %v906_v38 = vpack.c.bf16 %v108_v35, %v105_v33  ;;  %v109_v44 = vld [vmem:[#allocation2] sm:$0xff] }
  0x3c   :  { %871 = vmatpush1.bf16.msra.mxu1 %v870_v51  ;;  %v882_v34 = vpack.c.bf16 %v106_v32, %v103_v31  ;;  %v113_v37 = vld [vmem:[#allocation2 + $0x50] sm:$0xff]  ;;  %v114_v47 = vld [vmem:[#allocation2 + $0x58] sm:$0xff]  ;;  %v119_v49 = vld [vmem:[#allocation2 + $0xe0] sm:$0xff] }
  0x3d   :  { %845 = vmatpush3.bf16.msra.mxu0 %v844_v45  ;;  %873 = vmatprep.subr.bf16.mxu1 %v872_v12  ;;  %v908_v39 = vpack.c.bf16 %v113_v37, %v110_v36  ;;  %v189_v40 = vld [vmem:[#allocation4 + $0x30] sm:$0xff]  ;;  %v112_v45 = vld [vmem:[#allocation2 + $0x48] sm:$0xff]  ;;  %v116_v48 = vld [vmem:[#allocation2 + $0x98] sm:$0xff] }
  0x3e   :  { %846 = vmatprep.subr.bf16.mxu0 %v1075_v0  ;;  %v111_v46 = vld [vmem:[#allocation2 + $0x10] sm:$0xff]  ;;  %v910_v50 = vpack.c.bf16 %v112_v45, %v109_v44  ;;  %v912_v53 = vpack.c.bf16 %v119_v49, %v116_v48  ;;  %v118_v54 = vld [vmem:[#allocation2 + $0xd8] sm:$0xff]  ;;  %v120_v56 = vld [vmem:[#allocation2 + $0xe8] sm:$0xff] }
  0x3f   :  { %v115_v51 = vld [vmem:[#allocation2 + $0x90] sm:$0xff]  ;;  %v121_v61 = vld [vmem:[#allocation2 + $0x120] sm:$0xff]  ;;  %v124_v2 = vld [vmem:[#allocation2 + $0x168] sm:$0xff] }
  0x40   :  { %875 = vmatpush1.bf16.msra.mxu1 %v874_v15  ;;  %v914_v60 = vpack.c.bf16 %v118_v54, %v115_v51  ;;  %v126_v4 = vld [vmem:[#allocation2 + $0x178] sm:$0xff]  ;;  %v918_v7 = vpack.c.bf16 %v124_v2, %v121_v61  ;;  %v127_v8 = vld [vmem:[#allocation2 + $0x1b0] sm:$0xff]  ;;  %v129_v12 = vld [vmem:[#allocation2 + $0x1c0] sm:$0xff] }
  0x41   :  { %848 = vmatpush3.bf16.msra.mxu0 %v847_v52  ;;  %877 = vmatprep.subr.bf16.mxu1 %v876_v21  ;;  %v941_v52 = vpack.c.bf16 %v114_v47, %v111_v46  ;;  %v128_v5 = vld [vmem:[#allocation2 + $0x1b8] sm:$0xff]  ;;  %v132_v13 = vld [vmem:[#allocation2 + $0x208] sm:$0xff]  ;;  %v137_v15 = vld [vmem:[#allocation2 + $0x290] sm:$0xff] }
  0x42   :  { %849 = vmatprep.subr.bf16.mxu0 %v1075_v0  ;;  %v130_v11 = vld [vmem:[#allocation2 + $0x1f8] sm:$0xff]  ;;  %v134_v14 = vld [vmem:[#allocation2 + $0x248] sm:$0xff]  ;;  %v133_v17 = vld [vmem:[#allocation2 + $0x240] sm:$0xff] }
  0x43   :  { %v922_v16 = vpack.c.bf16 %v130_v11, %v127_v8  ;;  %v924_v19 = vpack.c.bf16 %v137_v15, %v134_v14  ;;  %v136_v20 = vld [vmem:[#allocation2 + $0x288] sm:$0xff]  ;;  %v135_v21 = vld [vmem:[#allocation2 + $0x250] sm:$0xff]  ;;  %v138_v22 = vld [vmem:[#allocation2 + $0x298] sm:$0xff] }
  0x44   :  { %879 = vmatpush1.bf16.msra.mxu1 %v878_v25  ;;  %v140_v23 = vld [vmem:[#allocation2 + $0x2d8] sm:$0xff]  ;;  %v143_v24 = vld [vmem:[#allocation2 + $0x320] sm:$0xff]  ;;  %v926_v25 = vpack.c.bf16 %v136_v20, %v133_v17  ;;  %v139_v26 = vld [vmem:[#allocation2 + $0x2d0] sm:$0xff]  ;;  %v953_v27 = vpack.c.bf16 %v138_v22, %v135_v21 }
  0x45   :  { %851 = vmatpush3.bf16.msra.mxu0 %v850_v55  ;;  %881 = vmatprep.subr.bf16.mxu1 %v880_v30  ;;  %v117_v55 = vld [vmem:[#allocation2 + $0xa0] sm:$0xff]  ;;  %v928_v28 = vpack.c.bf16 %v143_v24, %v140_v23  ;;  %v144_v31 = vld [vmem:[#allocation2 + $0x328] sm:$0xff]  ;;  %v149_v33 = vld [vmem:[#allocation2 + $0x3b0] sm:$0xff] }
  0x46   :  { %884 = vmatprep.subr.bf16.mxu0 %v1075_v0  ;;  %v141_v30 = vld [vmem:[#allocation2 + $0x2e0] sm:$0xff]  ;;  %v146_v32 = vld [vmem:[#allocation2 + $0x368] sm:$0xff]  ;;  %v151_v44 = vld [vmem:[#allocation2 + $0x3f0] sm:$0xff] }
  0x47   :  { %v145_v35 = vld [vmem:[#allocation2 + $0x360] sm:$0xff]  ;;  %v956_v36 = vpack.c.bf16 %v144_v31, %v141_v30  ;;  %v932_v37 = vpack.c.bf16 %v149_v33, %v146_v32  ;;  %v154_v47 = vld [vmem:[#allocation2 + $0x438] sm:$0xff]  ;;  %v156_v49 = vld [vmem:[#allocation2 + $0x448] sm:$0xff] }
  0x48   :  { %756 = vmatmul.mubr.f32.vlgmr.msra.gmra.mrb[0].mxu0 %v43_v58  ;;  %883 = vmatpush1.bf16.msra.mxu1 %v882_v34  ;;  %v122_v58 = vld [vmem:[#allocation2 + $0x128] sm:$0xff]  ;;  %v153_v48 = vld [vmem:[#allocation2 + $0x400] sm:$0xff]  ;;  %v172_v8 = vld [vmem:[#allocation2 + $0x238] sm:$0xff] }
  0x49   :  { %886 = vmatpush3.bf16.msra.mxu0 %v885_v59  ;;  %790 = vmatprep.mubr.msk.f32.mxu0 %vm1076_vm0, %v1077_v1  ;;  %v125_v59 = vld [vmem:[#allocation2 + $0x170] sm:$0xff]  ;;  %v962_v51 = vpack.c.bf16 %v156_v49, %v153_v48  ;;  %v160_v54 = vld [vmem:[#allocation2 + $0x88] sm:$0xff]  ;;  %v166_v2 = vld [vmem:[#allocation2 + $0x160] sm:$0xff] }
  0x4a   :  { %887 = vmatprep.subr.bf16.mxu0 %v1075_v0  ;;  %909 = vmatprep.subr.bf16.mxu1 %v908_v39  ;;  %v916_v63 = vpack.c.bf16 %v125_v59, %v122_v58  ;;  %v147_v39 = vld [vmem:[#allocation2 + $0x370] sm:$0xff]  ;;  %v164_v59 = vld [vmem:[#allocation2 + $0x118] sm:$0xff]  ;;  %v161_v61 = vld [vmem:[#allocation2 + $0xc8] sm:$0xff] }
  0x4b   :  { %v171_v11 = vld [vmem:[#allocation2 + $0x230] sm:$0xff]  ;;  %v176_v14 = vld [vmem:[#allocation2 + $0x2c8] sm:$0xff]  ;;  %v175_v17 = vld [vmem:[#allocation2 + $0x2c0] sm:$0xff] }
  0x4c   :  { %v180_v20 = vld [vmem:[#allocation2 + $0x358] sm:$0xff]  ;;  %v177_v21 = vld [vmem:[#allocation2 + $0x308] sm:$0xff]  ;;  %v179_v23 = vld [vmem:[#allocation2 + $0x350] sm:$0xff] }
  0x4d   :  { %889 = vmatpush3.bf16.msra.mxu0 %v888_v62  ;;  %v944_v62 = vpack.c.bf16 %v120_v56, %v117_v55  ;;  %v157_v56 = vld [vmem:[#allocation2 + $0x38] sm:$0xff]  ;;  %v182_v24 = vld [vmem:[#allocation2 + $0x3a0] sm:$0xff]  ;;  %v186_v30 = vld [vmem:[#allocation2 + $0x430] sm:$0xff] }
  0x4e   :  { %890 = vmatprep.subr.bf16.mxu0 %v1075_v0  ;;  %v188_v31 = vld [vmem:[#allocation2 + $0x478] sm:$0xff] }
  0x4f   :  { %v992_v33 = vpack.c.bf16 %v188_v31, %v186_v30 }
  0x51   :  { %892 = vmatpush3.bf16.msra.mxu0 %v891_v3  ;;  %v123_v3 = vld [vmem:[#allocation2 + $0x130] sm:$0xff] }
  0x52   :  { %893 = vmatprep.subr.bf16.mxu0 %v1075_v0 }
  0x55   :  { %895 = vmatpush3.bf16.msra.mxu0 %v894_v6  ;;  %v131_v6 = vld [vmem:[#allocation2 + $0x200] sm:$0xff] }
  0x56   :  { %896 = vmatprep.subr.bf16.mxu0 %v1075_v0  ;;  %v920_v10 = vpack.c.bf16 %v131_v6, %v128_v5  ;;  %v167_v5 = vld [vmem:[#allocation2 + $0x1a0] sm:$0xff] }
  0x59   :  { %898 = vmatpush3.bf16.msra.mxu0 %v897_v9  ;;  %v947_v9 = vpack.c.bf16 %v126_v4, %v123_v3  ;;  %v168_v3 = vld [vmem:[#allocation2 + $0x1a8] sm:$0xff] }
  0x5a   :  { %899 = vmatprep.subr.bf16.mxu0 %v1075_v0  ;;  %v972_v4 = vpack.c.bf16 %v168_v3, %v166_v2 }
  0x5d   :  { %901 = vmatpush3.bf16.msra.mxu0 %v900_v18  ;;  %v950_v18 = vpack.c.bf16 %v132_v13, %v129_v12  ;;  %v174_v13 = vld [vmem:[#allocation2 + $0x280] sm:$0xff] }
  0x5e   :  { %902 = vmatprep.subr.bf16.mxu0 %v1075_v0  ;;  %v980_v15 = vpack.c.bf16 %v176_v14, %v174_v13 }
  0x61   :  { %904 = vmatpush3.bf16.msra.mxu0 %v903_v29  ;;  %v142_v29 = vld [vmem:[#allocation2 + $0x318] sm:$0xff] }
  0x62   :  { %905 = vmatprep.subr.bf16.mxu0 %v1075_v0  ;;  %v930_v34 = vpack.c.bf16 %v142_v29, %v139_v26  ;;  %v986_v26 = vpack.c.bf16 %v179_v23, %v177_v21  ;;  %v183_v29 = vld [vmem:[#allocation2 + $0x3e0] sm:$0xff] }
  0x65   :  { %907 = vmatpush3.bf16.msra.mxu0 %v906_v38  ;;  %v148_v38 = vld [vmem:[#allocation2 + $0x3a8] sm:$0xff] }
  0x66   :  { %940 = vmatprep.subr.bf16.mxu0 %v1075_v0 }
 0x11b   :  { %v262_v41 = vpop.f32.mrb[0].mxu0 }
 0x11c   :  { %v263_v42 = vadd.f32 %v262_v41, %v189_v40  ;;  %v757_v43 = vpop.f32.mrb[1].mxu0  ;;  %v150_v40 = vld [vmem:[#allocation2 + $0x3b8] sm:$0xff] }
 0x11d   :  { %v152_v41 = vld [vmem:[#allocation2 + $0x3f8] sm:$0xff]  ;;  %v934_v43 = vpack.c.bf16 %v148_v38, %v145_v35  ;;  %v959_v45 = vpack.c.bf16 %v150_v40, %v147_v39  ;;  %v187_v35 = vld [vmem:[#allocation2 + $0x470] sm:$0xff] }
 0x11e   :  { %1007 = vtanh.f32 %v263_v42  ;;  %v155_v42 = vld [vmem:[#allocation2 + $0x440] sm:$0xff]  ;;  %v190_v39 = vld [vmem:[#allocation4 + $0x18] sm:$0xff] }
 0x11f   :  { %v936_v46 = vpack.c.bf16 %v155_v42, %v152_v41 }
 0x128   :  { %v1008_v57 = vpop.eup %1007 }
 0x129   :  { %332 = vmatmul.mubr.f32.vlgmr.msra.gmra.mrb[0].mxu1 %v1008_v57  ;;  %791 = vmatmul.mubr.f32.vlgmr.msra.gmra.mrb[2].mxu0 %v1008_v57  ;;  %v159_v57 = vld [vmem:[#allocation2 + $0x80] sm:$0xff] }
 0x12a   :  { %911 = vmatpush1.bf16.msra.mxu1 %v910_v50  ;;  %942 = vmatpush3.bf16.msra.mxu0 %v941_v52  ;;  %v938_v50 = vpack.c.bf16 %v154_v47, %v151_v44  ;;  %v1165_v52 = vld [vmem:[%s1181_s1] sm:$0xff]  ;;  %v966_v58 = vpack.c.bf16 %v159_v57, %v157_v56  ;;  %v192_v56 = vld [vmem:[#allocation4 + $0x28] sm:$0xff] }
 0x12b   :  { %913 = vmatprep.subr.bf16.mxu1 %v912_v53  ;;  %943 = vmatprep.subr.bf16.mxu0 %v1075_v0  ;;  %v158_v53 = vld [vmem:[#allocation2 + $0x40] sm:$0xff] }
 0x12c   :  { %472 = vmatprep.mubr.f32.mxu1 %v1077_v1  ;;  %825 = vmatprep.mubr.msk.f32.mxu0 %vm1076_vm0, %v1077_v1  ;;  %v964_v55 = vpack.c.bf16 %v160_v54, %v158_v53  ;;  %v193_v53 = vld [vmem:[#allocation4 + $0x10] sm:$0xff] }
 0x12e   :  { %915 = vmatpush1.bf16.msra.mxu1 %v914_v60  ;;  %945 = vmatpush3.bf16.msra.mxu0 %v944_v62  ;;  %v163_v62 = vld [vmem:[#allocation2 + $0x110] sm:$0xff] }
 0x12f   :  { %917 = vmatprep.subr.bf16.mxu1 %v916_v63  ;;  %946 = vmatprep.subr.bf16.mxu0 %v1075_v0  ;;  %v970_v63 = vpack.c.bf16 %v163_v62, %v161_v61 }
 0x132   :  { %919 = vmatpush1.bf16.msra.mxu1 %v918_v7  ;;  %948 = vmatpush3.bf16.msra.mxu0 %v947_v9  ;;  %v170_v7 = vld [vmem:[#allocation2 + $0x1f0] sm:$0xff] }
 0x133   :  { %921 = vmatprep.subr.bf16.mxu1 %v920_v10  ;;  %949 = vmatprep.subr.bf16.mxu0 %v1075_v0  ;;  %v976_v9 = vpack.c.bf16 %v172_v8, %v170_v7  ;;  %v169_v10 = vld [vmem:[#allocation2 + $0x1e8] sm:$0xff] }
 0x134   :  { %v978_v12 = vpack.c.bf16 %v171_v11, %v169_v10 }
 0x136   :  { %923 = vmatpush1.bf16.msra.mxu1 %v922_v16  ;;  %951 = vmatpush3.bf16.msra.mxu0 %v950_v18  ;;  %v173_v16 = vld [vmem:[#allocation2 + $0x278] sm:$0xff] }
 0x137   :  { %925 = vmatprep.subr.bf16.mxu1 %v924_v19  ;;  %952 = vmatprep.subr.bf16.mxu0 %v1075_v0  ;;  %v982_v18 = vpack.c.bf16 %v175_v17, %v173_v16  ;;  %v178_v19 = vld [vmem:[#allocation2 + $0x310] sm:$0xff] }
 0x138   :  { %v984_v22 = vpack.c.bf16 %v180_v20, %v178_v19 }
 0x13a   :  { %927 = vmatpush1.bf16.msra.mxu1 %v926_v25  ;;  %954 = vmatpush3.bf16.msra.mxu0 %v953_v27  ;;  %v184_v25 = vld [vmem:[#allocation2 + $0x3e8] sm:$0xff] }
 0x13b   :  { %929 = vmatprep.subr.bf16.mxu1 %v928_v28  ;;  %955 = vmatprep.subr.bf16.mxu0 %v1075_v0  ;;  %v988_v27 = vpack.c.bf16 %v184_v25, %v182_v24  ;;  %v181_v28 = vld [vmem:[#allocation2 + $0x398] sm:$0xff] }
 0x13c   :  { %v990_v32 = vpack.c.bf16 %v183_v29, %v181_v28 }
 0x13e   :  { %931 = vmatpush1.bf16.msra.mxu1 %v930_v34  ;;  %957 = vmatpush3.bf16.msra.mxu0 %v956_v36  ;;  %v185_v34 = vld [vmem:[#allocation2 + $0x428] sm:$0xff] }
 0x13f   :  { %933 = vmatprep.subr.bf16.mxu1 %v932_v37  ;;  %958 = vmatprep.subr.bf16.mxu0 %v1075_v0  ;;  %v994_v36 = vpack.c.bf16 %v187_v35, %v185_v34 }
 0x142   :  { %935 = vmatpush1.bf16.msra.mxu1 %v934_v43  ;;  %960 = vmatpush3.bf16.msra.mxu0 %v959_v45  ;;  %v191_v43 = vld [vmem:[#allocation4 + $0x20] sm:$0xff] }
 0x143   :  { %937 = vmatprep.subr.bf16.mxu1 %v936_v46  ;;  %961 = vmatprep.subr.bf16.mxu0 %v1075_v0  ;;  %v162_v0 = vld [vmem:[#allocation2 + $0xd0] sm:$0xff] }
 0x144   :  { %v968_v60 = vpack.c.bf16 %v164_v59, %v162_v0 }
 0x146   :  { %939 = vmatpush1.bf16.msra.mxu1 %v938_v50  ;;  %963 = vmatpush3.bf16.msra.mxu0 %v962_v51 }
 0x147   :  { %965 = vmatprep.subr.bf16.mxu1 %v964_v55 }
 0x149   :  { %473 = vmatmul.mubr.f32.vlgmr.msra.gmra.mrb[0].mxu1 %v1165_v52  ;;  %826 = vmatmul.mubr.f32.vlgmr.msra.gmra.mrb[4].mxu0 %v1165_v52 }
 0x14a   :  { %635 = vmatprep.mubr.f32.mxu1 %v1077_v1  ;;  %967 = vmatpush1.bf16.msra.mxu1 %v966_v58  ;;  %v165_v1 = vld [vmem:[#allocation2 + $0x158] sm:$0xff] }
 0x14b   :  { %969 = vmatprep.subr.bf16.mxu1 %v968_v60  ;;  %v974_v6 = vpack.c.bf16 %v167_v5, %v165_v1  ;;  %v195_v1 = vld [vmem:[#allocation4 + $0x40] sm:$0xff] }
 0x14e   :  { %971 = vmatpush1.bf16.msra.mxu1 %v970_v63 }
 0x14f   :  { %973 = vmatprep.subr.bf16.mxu1 %v972_v4  ;;  %v194_v4 = vld [vmem:[#allocation4 + $0x38] sm:$0xff] }
 0x152   :  { %975 = vmatpush1.bf16.msra.mxu1 %v974_v6 }
 0x153   :  { %977 = vmatprep.subr.bf16.mxu1 %v976_v9 }
 0x156   :  { %979 = vmatpush1.bf16.msra.mxu1 %v978_v12 }
 0x157   :  { %981 = vmatprep.subr.bf16.mxu1 %v980_v15 }
 0x15a   :  { %983 = vmatpush1.bf16.msra.mxu1 %v982_v18 }
 0x15b   :  { %985 = vmatprep.subr.bf16.mxu1 %v984_v22 }
 0x15e   :  { %987 = vmatpush1.bf16.msra.mxu1 %v986_v26 }
 0x15f   :  { %989 = vmatprep.subr.bf16.mxu1 %v988_v27 }
 0x162   :  { %991 = vmatpush1.bf16.msra.mxu1 %v990_v32 }
 0x163   :  { %993 = vmatprep.subr.bf16.mxu1 %v992_v33 }
 0x166   :  { %995 = vmatpush1.bf16.msra.mxu1 %v994_v36 }
 0x1fc   :  { %v404_v37 = vpop.f32.mrb[2].mxu0 }
 0x1fd   :  { %v792_v38 = vpop.f32.mrb[3].mxu0  ;;  %v405_v58 = vadd.f32 %v404_v37, %v192_v56 }
 0x21c   :  { %v474_v40 = vpop.f32.mrb[0].mxu1  ;;  %v545_v41 = vpop.f32.mrb[4].mxu0 }
 0x21d   :  { %v996_v42 = vadd.f32 %v474_v40, %v190_v39  ;;  %v476_v44 = vpop.f32.mrb[1].mxu1  ;;  %v827_v45 = vpop.f32.mrb[5].mxu0  ;;  %v563_v55 = vadd.f32 %v545_v41, %v193_v53 }
 0x21e   :  { %v997_v47 = vadd.f32 %v476_v44, %v191_v43 }
 0x21f   :  { %v670_v46 = vmul.f32 -1.442695, %v996_v42 }
 0x220   :  { %v671_v48 = vmul.f32 -1.442695, %v997_v47 }
 0x221   :  { %1009 = vpow2.f32 %v670_v46 }
 0x222   :  { %1011 = vpow2.f32 %v671_v48 }
 0x22b   :  { %v1010_v49 = vpop.eup %1009 }
 0x22c   :  { %v553_v50 = vadd.f32 1.0, %v1010_v49  ;;  %v1012_v51 = vpop.eup %1011 }
 0x22d   :  { %v560_v54 = vadd.f32 1.0, %v1012_v51 }
 0x22e   :  { %1013 = vrcp.f32 %v553_v50 }
 0x22f   :  { %1015 = vrcp.f32 %v560_v54 }
 0x238   :  { %v1014_v57 = vpop.eup %1013 }
 0x239   :  { %v564_v0 = vmul.f32 %v1014_v57, %v563_v55  ;;  %v1016_v60 = vpop.eup %1015 }
 0x23a   :  { %v567_v61 = vsub.f32 1.0, %v1016_v60  ;;  %v569_v2 = vmul.f32 %v1016_v60, %v1165_v52 }
 0x23b   :  { %v565_v59 = vadd.f32 %v564_v0, %v405_v58 }
 0x23d   :  { %1017 = vtanh.f32 %v565_v59 }
 0x247   :  { %v1018_v62 = vpop.eup %1017 }
 0x248   :  { %v568_v63 = vmul.f32 %v1018_v62, %v567_v61 }
 0x24a   :  { %v570_v3 = vadd.f32 %v569_v2, %v568_v63 }
 0x24c   :  { %636 = vmatmul.mubr.f32.vlgmr.msra.gmra.mrb[2].mxu1 %v570_v3  ;;  %663 = vst [vmem:[%s1184_s4 + $0x10] sm:$0xff] %v570_v3 }
 0x31f   :  { %v637_v5 = vpop.f32.mrb[2].mxu1 }
 0x320   :  { %v638_v6 = vadd.f32 %v637_v5, %v194_v4  ;;  %v639_v7 = vpop.f32.mrb[3].mxu1 }
 0x321   :  { %v640_v8 = vadd.f32 %v639_v7, %v195_v1 }
 0x322   :  { %661 = vst [vmem:[%s1184_s4] sm:$0xff] %v638_v6 }
 0x323   :  { %v645_v9 = vand.u32 2147483647, %v640_v8  ;;  %v642_v19 = vmax.f32 %v640_v8, 0.0  ;;  %vm643_vm2 = vcmp.ne.f32.partialorder %v640_v8, %v640_v8 }
 0x325   :  { %v646_v10 = vsub.f32 0.0, %v645_v9 }
 0x327   :  { %v647_v11 = vmul.f32 1.442695, %v646_v10 }
 0x329   :  { %1019 = vpow2.f32 %v647_v11 }
 0x333   :  { %v1020_v52 = vpop.eup %1019 }
 0x334   :  { %v649_v12 = vadd.f32 1.0, %v1020_v52  ;;  %v652_v13 = vmul.f32 -0.5, %v1020_v52  ;;  %v655_v15 = vand.u32 2147483647, %v1020_v52 }
 0x336   :  { %1021 = vlog2.f32 %v649_v12  ;;  %v653_v14 = vadd.f32 1.0, %v652_v13  ;;  %vm656_vm1 = vcmp.lt.f32.partialorder %v655_v15, 0.0004427343 }
 0x338   :  { %v654_v18 = vmul.f32 %v1020_v52, %v653_v14 }
 0x340   :  { %v1022_v16 = vpop.eup %1021 }
 0x341   :  { %v651_v17 = vmul.f32 0.6931472, %v1022_v16 }
 0x343   :  { %v657_v20 = vsel %vm656_vm1, %v654_v18, %v651_v17 }
 0x344   :  { %v658_v21 = vadd.f32 %v657_v20, %v642_v19 }
 0x346   :  { %v659_v22 = vsel %vm643_vm2, %v640_v8, %v658_v21 }
 0x347   :  { %v660_v23 = vadd.f32 1e-05, %v659_v22 }
 0x349   :  { %662 = vst [vmem:[%s1184_s4 + $0x8] sm:$0xff] %v660_v23 }
 0x34a   :  { %668 = vsyncpa [#allocation3], 1 }
 0x34b   :  { %669 = vsyncpa [#allocation5], 1 }

</bundles_post_ra>
